<compile_context>
chip_gen: v6e
topology: v6e:2x2x1
jax: 0.10.0
libtpu: 0.0.40
codegen_flags: <defaults>
</compile_context>

<pallas_src>
import jax
import jax.numpy as jnp
from jax.experimental import pallas as pl
from jax.experimental.pallas import tpu as pltpu


def _hbm_copy_kernel(x_hbm_ref, o_hbm_ref, sem):
    # Single whole-array HBM -> HBM DMA.  No VMEM staging, no grid.
    cp = pltpu.make_async_copy(x_hbm_ref, o_hbm_ref, sem)
    cp.start()
    cp.wait()


def _materialized_hbm_copy(audio: jax.Array) -> jax.Array:
    """Direct HBM->HBM DMA copy of `audio` into a fresh buffer."""
    nbytes = int(audio.size) * audio.dtype.itemsize
    return pl.pallas_call(
        _hbm_copy_kernel,
        out_shape=jax.ShapeDtypeStruct(audio.shape, audio.dtype),
        in_specs=[pl.BlockSpec(memory_space=pl.ANY)],
        out_specs=pl.BlockSpec(memory_space=pl.ANY),
        scratch_shapes=[pltpu.SemaphoreType.DMA(())],
        cost_estimate=pl.CostEstimate(
            flops=0, transcendentals=0, bytes_accessed=2 * nbytes
        ),
    )(audio)


def transform_audio_identity(
    audio: jax.Array, *, materialize_copy: bool = False
) -> jax.Array:
    """JAX equivalent of self.transform_audio = nn.Identity().

    Default (materialize_copy=False): returns `audio` as-is — zero cost,
    matching nn.Identity semantics (PyTorch Identity also returns the same
    tensor object, no copy).

    materialize_copy=True: returns an independent HBM buffer produced by a
    single direct HBM->HBM DMA (no VMEM staging, no aliasing).
    """
    if not materialize_copy:
        return audio
    return _materialized_hbm_copy(audio)


def batch_augmentation_forward(batch, *, materialize_copy: bool = False):
    """JAX/Pallas equivalent of BatchAugmentation.forward.

    batch: (audio, labels) where labels may be an array or a dict of arrays.
    Returns (augmented_audio, labels) with labels passed through unchanged.
    """
    audio, labels = batch
    augmented_audio = transform_audio_identity(
        audio, materialize_copy=materialize_copy
    )
    # Labels are passed through unchanged (no compute in the base class).
    return (augmented_audio, labels)


if __name__ == "__main__":
    key = jax.random.PRNGKey(0)
    k_audio, k_labels = jax.random.split(key)

    # Small Whisper-like shapes: batch=2, n_mels=16, time=256
    audio = jax.random.normal(k_audio, (2, 16, 256), dtype=jnp.float32)
    # labels as a dict of token ids / attention mask (seq=8)
    labels = {
        "input_ids": jax.random.randint(k_labels, (2, 8), 0, 100, dtype=jnp.int32),
        "attention_mask": jnp.ones((2, 8), dtype=jnp.int32),
    }

    # Primary (fast) path: pure pass-through, no kernel, no HBM traffic.
    aug_audio, out_labels = batch_augmentation_forward((audio, labels))
    jax.block_until_ready(aug_audio)
    jax.block_until_ready(out_labels)
    assert aug_audio.shape == audio.shape and aug_audio.dtype == audio.dtype
    assert bool(jnp.array_equal(aug_audio, audio))
    assert out_labels is labels

    # Optional copy path: exercise the Pallas HBM->HBM DMA kernel once.
    copied_audio, _ = batch_augmentation_forward(
        (audio, labels), materialize_copy=True
    )
    jax.block_until_ready(copied_audio)
    assert copied_audio.shape == audio.shape and copied_audio.dtype == audio.dtype
    assert bool(jnp.array_equal(copied_audio, audio))

    print("KERNEL_OK")
</pallas_src>

<mosaic_0001>
module attributes {stable_mosaic.version = 11 : i64} {
  func.func @_hbm_copy_kernel(%arg0: memref<2x16x256xf32, #tpu.memory_space<any>>, %arg1: memref<2x16x256xf32, #tpu.memory_space<any>>, %arg2: memref<!tpu.dma_semaphore, #tpu.memory_space<semaphore_mem>>) attributes {dimension_semantics = [], scalar_prefetch = 0 : i64, scratch_operands = 1 : i64, tpu.core_type = #tpu.core_type<tc>} {
    tpu.enqueue_dma source(%arg0 : memref<2x16x256xf32, #tpu.memory_space<any>>) target(%arg1 : memref<2x16x256xf32, #tpu.memory_space<any>>) target_semaphore(%arg2 : memref<!tpu.dma_semaphore, #tpu.memory_space<semaphore_mem>>)
    tpu.wait_dma2 semaphore(%arg2 : memref<!tpu.dma_semaphore, #tpu.memory_space<semaphore_mem>>) src(%arg0 : memref<2x16x256xf32, #tpu.memory_space<any>>) dst(%arg1 : memref<2x16x256xf32, #tpu.memory_space<any>>)
    return
  }
}

</mosaic_0001>

<bundles_post_ra>
// kernel: tpu_custom_call.1
= control target key start
LH: loop header
LB: loop body
LE: loop exit
PB: predicated region body
PF: predicated region fallthrough
CT: control target
= control target key end

     0   :  { %s30_s6 = smov [#allocation2]   ;;  %s31_s7 = smov 131072   ;;  %s49_s0 = inlined_call_operand.hbm [shape: f32[2,16,256], index: 0, kind: input, shape index: {}]   ;;  %s50_s1 = inlined_call_operand.hbm [shape: f32[2,16,256], index: 1, kind: output, shape index: {}]  }
   0x1   :  { %s32_s8 = smov 0  }
   0x2   :  { %12 = dma.general %s49_s0, 1024, %s50_s1, %s30_s6, %s31_s7, [#allocation4], %s32_s8, 0  }
   0x3   :  { %28 = dma.done.wait [#allocation2], 1024 }
   0x4   :  { %29 = vsyncadd [#allocation2], 4294966272 }
   0x5   :  { %18 = vsyncmov [#allocation2] }
   0x8   :  { %s19_s13 = vpop.sfrf %18 }
   0x9   :  { %p24_p0 = scmp.ne.s32.totalorder %s19_s13, 0 }
   0xb   :  { %23 = shalt.err (%p24_p0)  }

</bundles_post_ra>
